<compile_context>
chip_gen: v5e
topology: v5e:2x2
jax: 0.10.0
libtpu: 0.0.40
codegen_flags: <defaults>
</compile_context>

<pallas_src>
import math

import jax
import jax.numpy as jnp
from jax.experimental import pallas as pl
from jax.experimental.pallas import tpu as pltpu


# ----------------------------------------------------------------------------
# Glue: 1-D interpolation matrix matching torch.nn.functional.interpolate
# ('linear'/'bilinear') semantics.
# ----------------------------------------------------------------------------
def _interp_matrix(out_size: int, in_size: int, align_corners: bool) -> jnp.ndarray:
    out_idx = jnp.arange(out_size, dtype=jnp.float32)
    if align_corners:
        if out_size == 1:
            src = jnp.zeros((1,), dtype=jnp.float32)
        else:
            src = out_idx * (in_size - 1) / (out_size - 1)
    else:
        scale = in_size / out_size
        src = (out_idx + 0.5) * scale - 0.5
        # PyTorch clamps negative source coordinates to 0.
        src = jnp.maximum(src, 0.0)
    i0 = jnp.clip(jnp.floor(src).astype(jnp.int32), 0, in_size - 1)
    i1 = jnp.clip(i0 + 1, 0, in_size - 1)
    w1 = src - i0.astype(jnp.float32)
    w0 = 1.0 - w1
    m = jnp.zeros((out_size, in_size), dtype=jnp.float32)
    m = m.at[jnp.arange(out_size), i0].add(w0)
    m = m.at[jnp.arange(out_size), i1].add(w1)
    return m


# ----------------------------------------------------------------------------
# Channel-block selection: largest divisor of N*C whose per-step working set
# (double-buffered in/out blocks + matrices + intermediate) fits a conservative
# VMEM budget; prefer leaving >= 2 grid steps (v7x megacore).
# ----------------------------------------------------------------------------
def _pick_channel_block(nc, h_in, w_in, h_out, w_out, itemsize,
                        budget_bytes=6 * 2**20):
    def step_bytes(cb):
        a_hb = (cb * h_out) * (cb * h_in) * 4          # block-diag row matrix
        a_wt = w_in * w_out * 4
        x_blk = 2 * cb * h_in * w_in * itemsize        # double-buffered input
        o_blk = 2 * cb * h_out * w_out * itemsize      # double-buffered output
        t_blk = cb * h_out * w_in * 4                  # f32 intermediate
        return a_hb + a_wt + x_blk + o_blk + t_blk

    divisors = [d for d in range(1, nc + 1) if nc % d == 0]
    fits = [d for d in divisors if step_bytes(d) <= budget_bytes]
    if not fits:
        return 1
    multi = [d for d in fits if nc // d >= 2]
    return max(multi) if multi else max(fits)


# ----------------------------------------------------------------------------
# Pallas kernel: one channel block (Cb*H_in, W_in) -> (Cb*H_out, W_out)
# via two flat MXU matmuls (row pass with block-diagonal A_h, column pass
# with pre-transposed A_w^T).
# ----------------------------------------------------------------------------
def _upsample_kernel(a_hb_ref, a_wT_ref, x_ref, o_ref):
    x = x_ref[0]                                                   # (Cb*H_in, W_in)
    # Row interpolation for all Cb channels at once (block-diagonal A_h).
    t = jnp.dot(a_hb_ref[...], x, preferred_element_type=jnp.float32)
    # Column interpolation; keep MXU operands in the compute dtype, f32 acc.
    a_wT = a_wT_ref[...]                                           # (W_in, W_out)
    out = jnp.dot(t.astype(a_wT.dtype), a_wT,
                  preferred_element_type=jnp.float32)              # (Cb*H_out, W_out)
    o_ref[0] = out.astype(o_ref.dtype)


def upsample_bilinear(x: jnp.ndarray,
                      scale_factor: float = 2,
                      align_corners: bool = False) -> jnp.ndarray:
    """Equivalent of F.interpolate(x, scale_factor, mode='bilinear', align_corners)."""
    n, c, h_in, w_in = x.shape
    h_out = int(math.floor(h_in * scale_factor))
    w_out = int(math.floor(w_in * scale_factor))
    nc = n * c

    # bf16 operands on the MXU when the activation is bf16 (weights exact),
    # f32 otherwise.  Accumulation is always f32 inside the kernel.
    compute_dtype = jnp.bfloat16 if x.dtype == jnp.bfloat16 else jnp.float32

    a_h = _interp_matrix(h_out, h_in, align_corners)               # (H_out, H_in)
    a_wT = _interp_matrix(w_out, w_in, align_corners).T            # (W_in, W_out)

    cb = _pick_channel_block(nc, h_in, w_in, h_out, w_out, x.dtype.itemsize)
    g = nc // cb

    # Block-diagonal row-interp matrix: one matmul handles all Cb channels.
    a_hb = jnp.kron(jnp.eye(cb, dtype=jnp.float32), a_h).astype(compute_dtype)
    a_wT = a_wT.astype(compute_dtype)

    # Pure (zero-copy) reshape: (N, C, H, W) -> (G, Cb*H, W).
    xr = x.reshape(g, cb * h_in, w_in)

    out = pl.pallas_call(
        _upsample_kernel,
        out_shape=jax.ShapeDtypeStruct((g, cb * h_out, w_out), x.dtype),
        grid_spec=pltpu.PrefetchScalarGridSpec(
            num_scalar_prefetch=0,
            grid=(g,),
            in_specs=[
                # Interp matrices: resident across the whole grid (same block).
                pl.BlockSpec((cb * h_out, cb * h_in), lambda i: (0, 0)),
                pl.BlockSpec((w_in, w_out), lambda i: (0, 0)),
                # One channel block per grid step.
                pl.BlockSpec((1, cb * h_in, w_in), lambda i: (i, 0, 0)),
            ],
            out_specs=pl.BlockSpec((1, cb * h_out, w_out), lambda i: (i, 0, 0)),
        ),
        compiler_params=pltpu.CompilerParams(
            dimension_semantics=("parallel",)),
    )(a_hb, a_wT, xr)

    # Pure (zero-copy) reshape back to NCHW.
    return out.reshape(n, c, h_out, w_out)


class Upsample:
    """Pallas equivalent of the decode Upsample(scale_factor, mode, align_corners) module."""

    def __init__(self, scale_factor, mode, align_corners):
        if mode != "bilinear":
            # TODO(synk): only 'bilinear' (the decode UNet config) is implemented.
            raise NotImplementedError(f"mode={mode!r} not implemented")
        self.scale_factor = scale_factor
        self.align_corners = bool(align_corners)

    def __call__(self, x):
        return upsample_bilinear(x, self.scale_factor, self.align_corners)


# ----------------------------------------------------------------------------
# Pure-JAX reference (same math, no Pallas) for correctness checking.
# ----------------------------------------------------------------------------
def _upsample_ref(x, scale_factor=2, align_corners=False):
    _, _, h_in, w_in = x.shape
    a_h = _interp_matrix(int(h_in * scale_factor), h_in, align_corners)
    a_w = _interp_matrix(int(w_in * scale_factor), w_in, align_corners)
    return jnp.einsum('ph,nchw,qw->ncpq', a_h, x.astype(jnp.float32), a_w).astype(x.dtype)


if __name__ == "__main__":
    key = jax.random.PRNGKey(0)
    # Module config (decode UNet usage): scale_factor=2, mode='bilinear', align_corners=False
    x = jax.random.normal(key, (2, 4, 16, 16), dtype=jnp.float32)

    up = Upsample(scale_factor=2, mode="bilinear", align_corners=False)
    out = up(x)
    out = jax.block_until_ready(out)

    ref = _upsample_ref(x, scale_factor=2, align_corners=False)
    assert out.shape == (2, 4, 32, 32), out.shape
    assert jnp.allclose(out, ref, atol=1e-5, rtol=1e-5), float(jnp.max(jnp.abs(out - ref)))

    print("KERNEL_OK")
</pallas_src>

<mosaic_0001>
module attributes {stable_mosaic.version = 11 : i64} {
  func.func @_upsample_kernel(%arg0: i32, %arg1: memref<128x64xf32, #tpu.memory_space<vmem>>, %arg2: memref<16x32xf32, #tpu.memory_space<vmem>>, %arg3: memref<1x64x16xf32, #tpu.memory_space<vmem>>, %arg4: memref<1x128x32xf32, #tpu.memory_space<vmem>>) attributes {dimension_semantics = [#tpu.dimension_semantics<parallel>], iteration_bounds = array<i64: 2>, scalar_prefetch = 0 : i64, scratch_operands = 0 : i64, tpu.core_type = #tpu.core_type<tc>, window_params = [{pipeline_mode = #tpu.pipeline_mode<synchronous>, transform_indices = @transform_0, window_bounds = array<i64: 128, 64>}, {pipeline_mode = #tpu.pipeline_mode<synchronous>, transform_indices = @transform_1, window_bounds = array<i64: 16, 32>}, {transform_indices = @transform_2, window_bounds = array<i64: 1, 64, 16>}, {transform_indices = @transform_3, window_bounds = array<i64: 1, 128, 32>}]} {
    %c0 = arith.constant 0 : index
    %c0_0 = arith.constant 0 : index
    %c0_1 = arith.constant 0 : index
    %0 = vector.load %arg3[%c0, %c0_0, %c0_1] : memref<1x64x16xf32, #tpu.memory_space<vmem>>, vector<1x64x16xf32>
    %1 = vector.shape_cast %0 : vector<1x64x16xf32> to vector<64x16xf32>
    %c0_2 = arith.constant 0 : index
    %c0_3 = arith.constant 0 : index
    %2 = vector.load %arg1[%c0_2, %c0_3] : memref<128x64xf32, #tpu.memory_space<vmem>>, vector<128x64xf32>
    %cst = arith.constant dense<0.000000e+00> : vector<128x16xf32>
    %3 = tpu.matmul %2, %1, %cst {dimension_numbers = #tpu.dot_dimension_numbers<[1], [0], [0], [1], [0, 0, 1, 1], [], []>} : vector<128x64xf32>, vector<64x16xf32>, vector<128x16xf32> -> vector<128x16xf32>
    %c0_4 = arith.constant 0 : index
    %c0_5 = arith.constant 0 : index
    %4 = vector.load %arg2[%c0_4, %c0_5] : memref<16x32xf32, #tpu.memory_space<vmem>>, vector<16x32xf32>
    %cst_6 = arith.constant dense<0.000000e+00> : vector<128x32xf32>
    %5 = tpu.matmul %3, %4, %cst_6 {dimension_numbers = #tpu.dot_dimension_numbers<[1], [0], [0], [1], [0, 0, 1, 1], [], []>} : vector<128x16xf32>, vector<16x32xf32>, vector<128x32xf32> -> vector<128x32xf32>
    %c0_7 = arith.constant 0 : index
    %c0_8 = arith.constant 0 : index
    %c0_9 = arith.constant 0 : index
    %6 = vector.load %arg4[%c0_7, %c0_8, %c0_9] : memref<1x128x32xf32, #tpu.memory_space<vmem>>, vector<1x128x32xf32>
    %7 = vector.shape_cast %6 : vector<1x128x32xf32> to vector<128x32xf32>
    %8 = vector.shape_cast %5 : vector<128x32xf32> to vector<1x128x32xf32>
    tpu.vector_store %arg4[%c0_7, %c0_8, %c0_9], %8 {strides = array<i32>} : memref<1x128x32xf32, #tpu.memory_space<vmem>>, vector<1x128x32xf32>,
    return
  }
  func.func @transform_0(%arg0: i32) -> (i32, i32) {
    %c0_i32 = arith.constant 0 : i32
    %c0_i32_0 = arith.constant 0 : i32
    %c0_i32_1 = arith.constant 0 : i32
    return %c0_i32, %c0_i32_0 : i32, i32
  }
  func.func @transform_1(%arg0: i32) -> (i32, i32) {
    %c0_i32 = arith.constant 0 : i32
    %c0_i32_0 = arith.constant 0 : i32
    %c0_i32_1 = arith.constant 0 : i32
    return %c0_i32, %c0_i32_0 : i32, i32
  }
  func.func @transform_2(%arg0: i32) -> (i32, i32, i32) {
    %c0_i32 = arith.constant 0 : i32
    %c0_i32_0 = arith.constant 0 : i32
    %c0_i32_1 = arith.constant 0 : i32
    return %arg0, %c0_i32, %c0_i32_0 : i32, i32, i32
  }
  func.func @transform_3(%arg0: i32) -> (i32, i32, i32) {
    %c0_i32 = arith.constant 0 : i32
    %c0_i32_0 = arith.constant 0 : i32
    %c0_i32_1 = arith.constant 0 : i32
    return %arg0, %c0_i32, %c0_i32_0 : i32, i32, i32
  }
}

</mosaic_0001>

<bundles_post_ra>
// kernel: tpu_custom_call.1
= control target key start
LH: loop header
LB: loop body
LE: loop exit
PB: predicated region body
PF: predicated region fallthrough
CT: control target
= control target key end

     0   :  { %s588_s12 = smov 0   ;;  %s729_s0 = inlined_call_operand.vmem [shape: f32[128,64], index: 0, kind: input, shape index: {}]   ;;  %s730_s1 = inlined_call_operand.vmem [shape: f32[16,32], index: 1, kind: input, shape index: {}]   ;;  %s731_s2 = inlined_call_operand.vmem [shape: f32[2,64,16], index: 2, kind: input, shape index: {}]   ;;  %s732_s3 = inlined_call_operand.vmem [shape: f32[2,128,32], index: 3, kind: output, shape index: {}]  }
   0x1 LB: > { %s497_s13 = sadd.s32 4294967295, %s566_s12   ;;  %p501_p0 = scmp.ge.s32.totalorder %s566_s12, 1  ;;  %s566_s12 = sphi %s588_s12, %s13_s12  }
   0x2   : > { %p137_p1 = scmp.lt.s32.totalorder %s566_s12, 3 }
   0x4   : > { %p138_p2 = pnand %p501_p0, %p137_p1 }
   0x5   : > { %p161_p3 = scmp.lt.s32.totalorder (!%p138_p2), %s497_s13, 1 }
   0x6   : > { %141 = sbr.rel (%p138_p2) target bundleno = 351 (0x15f), region = 32 }
   0xb   : > { %s734_s13 = smov (!%p161_p3, %s497_s13), 1  ;;  %v179_v8 = vld [vmem:[%s729_s0] sm:$0xff]  ;;  %vm195_vm0 = vcmask 523264   ;;  %v180_v10 = vld [vmem:[%s729_s0 + $0x8] sm:$0xff]  ;;  %v181_v12 = vld [vmem:[%s729_s0 + $0x10] sm:$0xff]  ;;  %vm311_vm1 = vcmask 130048  }
   0xc   : > { %s540_s14 = sshll.u32 %s734_s13, 6  ;;  %v187_v9 = vld [vmem:[%s729_s0 + $0x40] sm:$0xff]  ;;  %v188_v11 = vld [vmem:[%s729_s0 + $0x48] sm:$0xff]  ;;  %v189_v13 = vld [vmem:[%s729_s0 + $0x50] sm:$0xff]  ;;  %s541_s29 = sshll.u32 %s734_s13, 7  ;;  %vm425_vm2 = vcmask 261120  }
   0xd   : > { %s165_s17 = scalar_lea.vmem %s731_s2, %s540_s14  ;;  %v182_v14 = vld [vmem:[%s729_s0 + $0x18] sm:$0xff]  ;;  %v310_v16 = vld [vmem:[%s730_s1 + $0x8] sm:$0xff]  ;;  %v183_v17 = vld [vmem:[%s729_s0 + $0x20] sm:$0xff]  ;;  %s692_s5 = scalar_lea.vmem %s732_s3, %s541_s29 }
   0xe   : > { %v178_v0 = vld [vmem:[%s165_s17 + $0x38] sm:$0xff]  ;;  %v177_v1 = vld [vmem:[%s165_s17 + $0x30] sm:$0xff]  ;;  %v176_v2 = vld [vmem:[%s165_s17 + $0x28] sm:$0xff]  ;;  %374 = vmatpush.msra.mxu1 %v310_v16  ;;  %550 = vmatpush.msra.mxu3 %v310_v16 }
   0xf   : > { %252 = vmatpush.msra.mxu0 %v178_v0  ;;  %542 = vmatpush.msra.mxu2 %v178_v0  ;;  %v175_v3 = vld [vmem:[%s165_s17 + $0x20] sm:$0xff]  ;;  %v174_v4 = vld [vmem:[%s165_s17 + $0x18] sm:$0xff]  ;;  %v173_v5 = vld [vmem:[%s165_s17 + $0x10] sm:$0xff] }
  0x10   : > { %v172_v6 = vld [vmem:[%s165_s17 + $0x8] sm:$0xff]  ;;  %v171_v7 = vld [vmem:[%s165_s17] sm:$0xff]  ;;  %v190_v15 = vld [vmem:[%s729_s0 + $0x58] sm:$0xff] }
  0x11   : > { %253 = vmatpush.msra.mxu0 %v177_v1  ;;  %543 = vmatpush.msra.mxu2 %v177_v1  ;;  %v191_v18 = vld [vmem:[%s729_s0 + $0x60] sm:$0xff]  ;;  %v184_v19 = vld [vmem:[%s729_s0 + $0x28] sm:$0xff]  ;;  %v185_v21 = vld [vmem:[%s729_s0 + $0x30] sm:$0xff] }
  0x12   : > { %v192_v20 = vld [vmem:[%s729_s0 + $0x68] sm:$0xff]  ;;  %v193_v22 = vld [vmem:[%s729_s0 + $0x70] sm:$0xff]  ;;  %v186_v23 = vld [vmem:[%s729_s0 + $0x38] sm:$0xff] }
  0x13   : > { %254 = vmatpush.msra.mxu0 %v176_v2  ;;  %544 = vmatpush.msra.mxu2 %v176_v2  ;;  %v194_v24 = vld [vmem:[%s729_s0 + $0x78] sm:$0xff]  ;;  %v309_v25 = vld [vmem:[%s730_s1] sm:$0xff] }
  0x14   : > { %375 = vmatpush.msra.mxu1 %v309_v25  ;;  %551 = vmatpush.msra.mxu3 %v309_v25 }
  0x15   : > { %255 = vmatpush.msra.mxu0 %v175_v3  ;;  %545 = vmatpush.msra.mxu2 %v175_v3 }
  0x17   : > { %256 = vmatpush.msra.mxu0 %v174_v4  ;;  %546 = vmatpush.msra.mxu2 %v174_v4 }
  0x19   : > { %257 = vmatpush.msra.mxu0 %v173_v5  ;;  %547 = vmatpush.msra.mxu2 %v173_v5 }
  0x1b   : > { %258 = vmatpush.msra.mxu0 %v172_v6  ;;  %548 = vmatpush.msra.mxu2 %v172_v6 }
  0x1d   : > { %259 = vmatpush.msra.mxu0 %v171_v7  ;;  %549 = vmatpush.msra.mxu2 %v171_v7 }
  0x1e   : > { %506 = vmatmul.msk.f32.vlgmr.msra.gmra.mxu0 %vm195_vm0, %v179_v8  ;;  %514 = vmatmul.msk.f32.vlgmr.msra.gmra.mxu2 %vm195_vm0, %v187_v9 }
  0x26   : > { %507 = vmatmul.msk.f32.gmra.mxu0 %vm195_vm0, %v180_v10  ;;  %515 = vmatmul.msk.f32.gmra.mxu2 %vm195_vm0, %v188_v11 }
  0x2e   : > { %508 = vmatmul.msk.f32.gmra.mxu0 %vm195_vm0, %v181_v12  ;;  %516 = vmatmul.msk.f32.gmra.mxu2 %vm195_vm0, %v189_v13 }
  0x36   : > { %509 = vmatmul.msk.f32.gmra.mxu0 %vm195_vm0, %v182_v14  ;;  %517 = vmatmul.msk.f32.gmra.mxu2 %vm195_vm0, %v190_v15 }
  0x3e   : > { %510 = vmatmul.msk.f32.gmra.mxu0 %vm195_vm0, %v183_v17  ;;  %518 = vmatmul.msk.f32.gmra.mxu2 %vm195_vm0, %v191_v18 }
  0x46   : > { %511 = vmatmul.msk.f32.gmra.mxu0 %vm195_vm0, %v184_v19  ;;  %519 = vmatmul.msk.f32.gmra.mxu2 %vm195_vm0, %v192_v20 }
  0x4e   : > { %512 = vmatmul.msk.f32.gmra.mxu0 %vm195_vm0, %v185_v21  ;;  %520 = vmatmul.msk.f32.gmra.mxu2 %vm195_vm0, %v193_v22 }
  0x56   : > { %513 = vmatmul.msk.f32.gmra.mxu0 %vm195_vm0, %v186_v23  ;;  %521 = vmatmul.msk.f32.gmra.mxu2 %vm195_vm0, %v194_v24 }
  0x9b   : > { %v261_v26 = vpop.f32.mrf.mxu0 }
  0x9c   : > { %522 = vmatmul.msk.f32.vlgmr.msra.gmra.mxu1 %vm311_vm1, %v261_v26 }
  0xa1   : > { %v285_v27 = vpop.f32.mrf.mxu2 }
  0xa3   : > { %v264_v28 = vpop.f32.mrf.mxu0 }
  0xa4   : > { %523 = vmatmul.msk.f32.gmra.mxu1 %vm311_vm1, %v264_v28 }
  0xa9   : > { %v288_v29 = vpop.f32.mrf.mxu2 }
  0xaa   : > { %531 = vmatmul.msk.f32.vlgmr.msra.gmra.mxu3 %vm311_vm1, %v288_v29 }
  0xab   : > { %v267_v30 = vpop.f32.mrf.mxu0 }
  0xac   : > { %524 = vmatmul.msk.f32.gmra.mxu1 %vm311_vm1, %v267_v30 }
  0xb1   : > { %v291_v31 = vpop.f32.mrf.mxu2 }
  0xb2   : > { %532 = vmatmul.msk.f32.gmra.mxu3 %vm311_vm1, %v291_v31 }
  0xb3   : > { %v270_v32 = vpop.f32.mrf.mxu0 }
  0xb4   : > { %525 = vmatmul.msk.f32.gmra.mxu1 %vm311_vm1, %v270_v32 }
  0xb9   : > { %v294_v33 = vpop.f32.mrf.mxu2 }
  0xba   : > { %533 = vmatmul.msk.f32.gmra.mxu3 %vm311_vm1, %v294_v33 }
  0xbb   : > { %v273_v34 = vpop.f32.mrf.mxu0 }
  0xbc   : > { %526 = vmatmul.msk.f32.gmra.mxu1 %vm311_vm1, %v273_v34 }
  0xc1   : > { %v297_v35 = vpop.f32.mrf.mxu2 }
  0xc2   : > { %534 = vmatmul.msk.f32.gmra.mxu3 %vm311_vm1, %v297_v35 }
  0xc3   : > { %v276_v36 = vpop.f32.mrf.mxu0 }
  0xc4   : > { %527 = vmatmul.msk.f32.gmra.mxu1 %vm311_vm1, %v276_v36 }
  0xc9   : > { %v300_v37 = vpop.f32.mrf.mxu2 }
  0xca   : > { %535 = vmatmul.msk.f32.gmra.mxu3 %vm311_vm1, %v300_v37 }
  0xcb   : > { %v279_v38 = vpop.f32.mrf.mxu0 }
  0xcc   : > { %528 = vmatmul.msk.f32.gmra.mxu1 %vm311_vm1, %v279_v38 }
  0xd1   : > { %v303_v39 = vpop.f32.mrf.mxu2 }
  0xd2   : > { %536 = vmatmul.msk.f32.gmra.mxu3 %vm311_vm1, %v303_v39 }
  0xd3   : > { %v282_v40 = vpop.f32.mrf.mxu0 }
  0xd4   : > { %529 = vmatmul.msk.f32.gmra.mxu1 %vm311_vm1, %v282_v40 }
  0xd9   : > { %v306_v41 = vpop.f32.mrf.mxu2 }
  0xda   : > { %537 = vmatmul.msk.f32.gmra.mxu3 %vm311_vm1, %v306_v41 }
  0xdc   : > { %530 = vmatmul.msk.f32.gmra.mxu1 %vm311_vm1, %v285_v27 }
 0x119   : > { %v377_v42 = vpop.f32.mrf.mxu1 }
 0x11a   : > { %426 = vst.msk [vmem:[%s692_s5] sm:$0xff] %vm425_vm2, %v377_v42 }
 0x121   : > { %v380_v43 = vpop.f32.mrf.mxu1 }
 0x122   : > { %427 = vst.msk [vmem:[%s692_s5 + $0x8] sm:$0xff] %vm425_vm2, %v380_v43 }
 0x129   : > { %v383_v44 = vpop.f32.mrf.mxu1 }
 0x12a   : > { %428 = vst.msk [vmem:[%s692_s5 + $0x10] sm:$0xff] %vm425_vm2, %v383_v44 }
 0x12d   : > { %v404_v45 = vpop.f32.mrf.mxu3 }
 0x12e   : > { %435 = vst.msk [vmem:[%s692_s5 + $0x48] sm:$0xff] %vm425_vm2, %v404_v45 }
 0x131   : > { %v386_v46 = vpop.f32.mrf.mxu1 }
 0x132   : > { %429 = vst.msk [vmem:[%s692_s5 + $0x18] sm:$0xff] %vm425_vm2, %v386_v46 }
 0x135   : > { %v407_v47 = vpop.f32.mrf.mxu3 }
 0x136   : > { %436 = vst.msk [vmem:[%s692_s5 + $0x50] sm:$0xff] %vm425_vm2, %v407_v47 }
 0x139   : > { %v389_v48 = vpop.f32.mrf.mxu1 }
 0x13a   : > { %430 = vst.msk [vmem:[%s692_s5 + $0x20] sm:$0xff] %vm425_vm2, %v389_v48 }
 0x13d   : > { %v410_v49 = vpop.f32.mrf.mxu3 }
 0x13e   : > { %437 = vst.msk [vmem:[%s692_s5 + $0x58] sm:$0xff] %vm425_vm2, %v410_v49 }
 0x141   : > { %v392_v50 = vpop.f32.mrf.mxu1 }
 0x142   : > { %431 = vst.msk [vmem:[%s692_s5 + $0x28] sm:$0xff] %vm425_vm2, %v392_v50 }
 0x145   : > { %v413_v51 = vpop.f32.mrf.mxu3 }
 0x146   : > { %438 = vst.msk [vmem:[%s692_s5 + $0x60] sm:$0xff] %vm425_vm2, %v413_v51 }
 0x149   : > { %v395_v52 = vpop.f32.mrf.mxu1 }
 0x14a   : > { %432 = vst.msk [vmem:[%s692_s5 + $0x30] sm:$0xff] %vm425_vm2, %v395_v52 }
 0x14d   : > { %v416_v53 = vpop.f32.mrf.mxu3 }
 0x14e   : > { %439 = vst.msk [vmem:[%s692_s5 + $0x68] sm:$0xff] %vm425_vm2, %v416_v53 }
 0x151   : > { %v398_v54 = vpop.f32.mrf.mxu1 }
 0x152   : > { %433 = vst.msk [vmem:[%s692_s5 + $0x38] sm:$0xff] %vm425_vm2, %v398_v54 }
 0x155   : > { %v419_v55 = vpop.f32.mrf.mxu3 }
 0x156   : > { %440 = vst.msk [vmem:[%s692_s5 + $0x70] sm:$0xff] %vm425_vm2, %v419_v55 }
 0x159   : > { %v401_v56 = vpop.f32.mrf.mxu1 }
 0x15a   : > { %434 = vst.msk [vmem:[%s692_s5 + $0x40] sm:$0xff] %vm425_vm2, %v401_v56 }
 0x15d   : > { %v422_v57 = vpop.f32.mrf.mxu3 }
 0x15e   : > { %441 = vst.msk [vmem:[%s692_s5 + $0x78] sm:$0xff] %vm425_vm2, %v422_v57 }
 0x15f PF: > { %s13_s12 = sadd.s32 1, %s566_s12  }
 0x160   : > { %p10_p4 = scmp.ge.s32.totalorder %s13_s12, 4  }
 0x162   :  { %12 = sbr.rel (!%p10_p4) target bundleno = 1 (0x1), region = 62 }

</bundles_post_ra>
